<compile_context>
chip_gen: v6e
topology: v6e:2x2x1
jax: 0.10.0
libtpu: 0.0.40
codegen_flags: <defaults>
</compile_context>

<pallas_src>
import math

import jax
import jax.numpy as jnp
from jax.experimental import pallas as pl
from jax.experimental.pallas import tpu as pltpu


# --------------------------------------------------------------------------- kernel
def make_decoder_critic_kernel(B, n, dm):
    inv_n = 1.0 / float(n)   # compile-time-constant multiply, no VALU divide

    def kernel(x_ref, slab_ref, o_ref):
        x3 = x_ref[...]                                   # (B, n, dm) f32

        v_nodes = slab_ref[0:1, :]                        # (1, dm)  Wnodes^T wdm
        v_graph = slab_ref[1:2, :]                        # (1, dm)  Wgraph^T wdm
        wn_row = slab_ref[2:3, 0:n]                       # (1, n)   linear_n weights
        c = slab_ref[3:4, 0:1]                            # (1, 1)   folded pre-ReLU bias
        bn = slab_ref[3:4, 1:2]                           # (1, 1)   linear_n bias

        # Folded linear_nodes/linear_graph/linear_dm: two dm-length projections.
        t_nodes = jnp.sum(x3 * v_nodes, axis=-1)          # (B, n)
        t_graph = jnp.sum(x3 * v_graph, axis=-1)          # (B, n)

        # linear_graph(x.mean(1)) == mean_n(x @ Wg^T): mean commutes with the
        # linear map, so semantics are unchanged (up to FP reordering).
        g = jnp.sum(t_graph, axis=-1, keepdims=True) * inv_n   # (B, 1)

        z = jnp.maximum(t_nodes + g + c, 0.0)             # (B, n)  == relu(linear_dm(y))

        # linear_n + squeeze -> (B,), emitted lane-dense as (1, B).
        o_ref[...] = jnp.dot(wn_row, z.T,
                             preferred_element_type=jnp.float32) + bn   # (1, B)

    return kernel


# ------------------------------------------------------------------ one-time packing
def pack_params(params, *, n, dm):
    """One-time weight preparation (amortized across all forward calls).

    Folds linear_dm into linear_nodes / linear_graph and packs everything the
    kernel needs into a single (8, dm) f32 slab:
        row 0: v_nodes = Wnodes^T wdm
        row 1: v_graph = Wgraph^T wdm
        row 2: linear_n weights, zero-padded to dm lanes
        row 3: [c, bn, 0, ...]  with c = (bnodes + bgraph).wdm + bdm
    """
    f32 = jnp.float32
    wg, bg = params['graph']        # torch layout: (dm, dm), (dm,)
    wnod, bnod = params['nodes']    # (dm, dm), (dm,)
    wdm, bdm = params['dm']         # (1, dm), (1,)
    wln, bln = params['n']          # (1, n), (1,)
    assert n <= dm, "packing assumes n <= dm (linear_n row fits one slab row)"

    wdm0 = wdm[0].astype(f32)                         # (dm,)
    v_nodes = wnod.astype(f32).T @ wdm0               # (dm,)
    v_graph = wg.astype(f32).T @ wdm0                 # (dm,)
    c = (jnp.dot(bnod.astype(f32), wdm0)
         + jnp.dot(bg.astype(f32), wdm0)
         + bdm.astype(f32)[0])

    slab = jnp.zeros((8, dm), f32)
    slab = slab.at[0].set(v_nodes)
    slab = slab.at[1].set(v_graph)
    slab = slab.at[2, :n].set(wln[0].astype(f32))
    slab = slab.at[3, 0].set(c)
    slab = slab.at[3, 1].set(bln.astype(f32)[0])
    return slab


# --------------------------------------------------------------------------- wrapper
def decoder_critic_forward(x, slab):
    B, n, dm = x.shape
    f32 = jnp.float32

    # VMEM budget from actual operand sizes (padded tiles) + generous headroom.
    x_bytes = B * n * dm * 4
    slab_bytes = 8 * dm * 4
    out_bytes = 8 * 128 * 4
    vmem_limit = max(4 << 20, 8 * (x_bytes + slab_bytes + out_bytes))

    out = pl.pallas_call(
        make_decoder_critic_kernel(B, n, dm),
        out_shape=jax.ShapeDtypeStruct((1, B), f32),
        in_specs=[pl.BlockSpec(memory_space=pltpu.MemorySpace.VMEM),   # x
                  pl.BlockSpec(memory_space=pltpu.MemorySpace.VMEM)],  # packed slab
        out_specs=pl.BlockSpec(memory_space=pltpu.MemorySpace.VMEM),
        compiler_params=pltpu.CompilerParams(vmem_limit_bytes=int(vmem_limit)),
    )(x.astype(f32), slab)
    return out[0, :]                 # (B,) — matches torch .squeeze() for B > 1


# ------------------------------------------------------------------------ parameters
def _init_linear(key, fin, fout):
    # deterministic init mimicking torch defaults: U(-1/sqrt(fin), 1/sqrt(fin))
    k1, k2 = jax.random.split(key)
    bound = 1.0 / math.sqrt(fin)
    w = jax.random.uniform(k1, (fout, fin), jnp.float32, -bound, bound)  # torch layout
    b = jax.random.uniform(k2, (fout,), jnp.float32, -bound, bound)
    return w, b


def init_params(key, n, dm):
    k = jax.random.split(key, 4)
    return {'graph': _init_linear(k[0], dm, dm),
            'nodes': _init_linear(k[1], dm, dm),
            'dm': _init_linear(k[2], dm, 1),
            'n': _init_linear(k[3], n, 1)}


# ------------------------------------------------------------------------ reference
def decoder_critic_ref(x, params):
    wg, bg = params['graph']
    wnod, bnod = params['nodes']
    wdm, bdm = params['dm']
    wln, bln = params['n']
    x_graph = x.mean(axis=1)
    lp_graph = x_graph @ wg.T + bg
    lp_nodes = x @ wnod.T + bnod
    y = lp_nodes + lp_graph[:, None, :]
    z = jnp.maximum((y @ wdm.T + bdm)[..., 0], 0.0)     # squeeze -> (B, n), ReLU
    return (z @ wln.T + bln)[..., 0]                    # squeeze -> (B,)


# ------------------------------------------------------------------------------ main
if __name__ == "__main__":
    B, n, dm = 2, 8, 128     # small shapes consistent with DecoderCritic(n, dm=128)

    key = jax.random.PRNGKey(0)
    kx, kp = jax.random.split(key)
    x = jax.random.normal(kx, (B, n, dm), jnp.float32)
    params = init_params(kp, n, dm)

    # One-time packing (hoisted out of the per-call path on purpose).
    slab = pack_params(params, n=n, dm=dm)

    fwd = jax.jit(lambda xx: decoder_critic_forward(xx, slab))
    out = fwd(x)
    jax.block_until_ready(out)

    ref = decoder_critic_ref(x, params)
    assert out.shape == (B,) and out.dtype == jnp.float32
    assert bool(jnp.all(jnp.isfinite(out)))
    assert bool(jnp.allclose(out, ref, rtol=5e-3, atol=5e-3)), (out, ref)
    print("KERNEL_OK")
</pallas_src>

<mosaic_0001>
module attributes {stable_mosaic.version = 11 : i64} {
  func.func @kernel(%arg0: memref<2x8x128xf32, #tpu.memory_space<vmem>>, %arg1: memref<8x128xf32, #tpu.memory_space<vmem>>, %arg2: memref<1x2xf32, #tpu.memory_space<vmem>>) attributes {dimension_semantics = [], scalar_prefetch = 0 : i64, scratch_operands = 0 : i64, tpu.core_type = #tpu.core_type<tc>} {
    %c0 = arith.constant 0 : index
    %c0_0 = arith.constant 0 : index
    %c0_1 = arith.constant 0 : index
    %0 = vector.load %arg0[%c0, %c0_0, %c0_1] : memref<2x8x128xf32, #tpu.memory_space<vmem>>, vector<2x8x128xf32>
    %c0_2 = arith.constant 0 : index
    %c0_3 = arith.constant 0 : index
    %1 = vector.load %arg1[%c0_2, %c0_3] : memref<8x128xf32, #tpu.memory_space<vmem>>, vector<1x128xf32>
    %c1 = arith.constant 1 : index
    %c0_4 = arith.constant 0 : index
    %2 = vector.load %arg1[%c1, %c0_4] : memref<8x128xf32, #tpu.memory_space<vmem>>, vector<1x128xf32>
    %c2 = arith.constant 2 : index
    %c0_5 = arith.constant 0 : index
    %3 = vector.load %arg1[%c2, %c0_5] : memref<8x128xf32, #tpu.memory_space<vmem>>, vector<1x8xf32>
    %c3 = arith.constant 3 : index
    %c0_6 = arith.constant 0 : index
    %4 = vector.load %arg1[%c3, %c0_6] : memref<8x128xf32, #tpu.memory_space<vmem>>, vector<1x1xf32>
    %c3_7 = arith.constant 3 : index
    %c1_8 = arith.constant 1 : index
    %5 = vector.load %arg1[%c3_7, %c1_8] : memref<8x128xf32, #tpu.memory_space<vmem>>, vector<1x1xf32>
    %6 = vector.shape_cast %1 : vector<1x128xf32> to vector<1x1x128xf32>
    %7 = vector.broadcast %6 : vector<1x1x128xf32> to vector<2x8x128xf32>
    %8 = arith.mulf %0, %7 : vector<2x8x128xf32>
    %cst = arith.constant dense<0.000000e+00> : vector<2x8xf32>
    %9 = vector.multi_reduction <add>, %8, %cst [2] : vector<2x8x128xf32> to vector<2x8xf32>
    %10 = vector.shape_cast %2 : vector<1x128xf32> to vector<1x1x128xf32>
    %11 = vector.broadcast %10 : vector<1x1x128xf32> to vector<2x8x128xf32>
    %12 = arith.mulf %0, %11 : vector<2x8x128xf32>
    %cst_9 = arith.constant dense<0.000000e+00> : vector<2x8xf32>
    %13 = vector.multi_reduction <add>, %12, %cst_9 [2] : vector<2x8x128xf32> to vector<2x8xf32>
    %cst_10 = arith.constant dense<0.000000e+00> : vector<2xf32>
    %14 = vector.multi_reduction <add>, %13, %cst_10 [1] : vector<2x8xf32> to vector<2xf32>
    %15 = vector.shape_cast %14 : vector<2xf32> to vector<2x1xf32>
    %cst_11 = arith.constant 1.250000e-01 : f32
    %16 = vector.broadcast %cst_11 : f32 to vector<2x1xf32>
    %17 = arith.mulf %15, %16 : vector<2x1xf32>
    %18 = vector.broadcast %17 : vector<2x1xf32> to vector<2x8xf32>
    %19 = arith.addf %9, %18 : vector<2x8xf32>
    %20 = vector.broadcast %4 : vector<1x1xf32> to vector<2x8xf32>
    %21 = arith.addf %19, %20 : vector<2x8xf32>
    %cst_12 = arith.constant 0.000000e+00 : f32
    %22 = vector.broadcast %cst_12 : f32 to vector<2x8xf32>
    %23 = arith.maximumf %21, %22 : vector<2x8xf32>
    %24 = tpu.transpose %23, [1, 0] : vector<2x8xf32> -> vector<8x2xf32>
    %cst_13 = arith.constant dense<0.000000e+00> : vector<1x2xf32>
    %25 = tpu.matmul %3, %24, %cst_13 {dimension_numbers = #tpu.dot_dimension_numbers<[1], [0], [0], [1], [0, 0, 1, 1], [], []>} : vector<1x8xf32>, vector<8x2xf32>, vector<1x2xf32> -> vector<1x2xf32>
    %26 = vector.broadcast %5 : vector<1x1xf32> to vector<1x2xf32>
    %27 = arith.addf %25, %26 : vector<1x2xf32>
    %c0_14 = arith.constant 0 : index
    %c0_15 = arith.constant 0 : index
    %28 = vector.load %arg2[%c0_14, %c0_15] : memref<1x2xf32, #tpu.memory_space<vmem>>, vector<1x2xf32>
    tpu.vector_store %arg2[%c0_14, %c0_15], %27 {strides = array<i32>} : memref<1x2xf32, #tpu.memory_space<vmem>>, vector<1x2xf32>,
    return
  }
}

</mosaic_0001>

<bundles_post_ra>
// kernel: _lambda_.1
= control target key start
LH: loop header
LB: loop body
LE: loop exit
PB: predicated region body
PF: predicated region fallthrough
CT: control target
= control target key end

     0   :  { %7 = vsyncpa [#allocation3], 0  ;;  %s346_s0 = inlined_call_operand.hbm [shape: f32[2,8,128], index: 0, kind: input, shape index: {}]   ;;  %s347_s1 = inlined_call_operand.hbm [shape: f32[8,128], index: 1, kind: input, shape index: {}]   ;;  %s348_s2 = inlined_call_operand.hbm [shape: f32[1,2], index: 2, kind: output, shape index: {}]  }
   0x1   :  { %8 = vsyncpa [#allocation6], 0 }
   0x2   :  { %9 = vsyncpa [#allocation4], 0  ;;  %s311_s9 = smov [#allocation2]  }
   0x3   :  { %s15_s10 = sshll.u32 %s311_s9, 4  ;;  %s16_s10 = int_to_ptr.vmem [resolvable:$true] %s15_s10 }
   0x4   :  { %s253_s11 = scalar_lea.vmem %s16_s10, 256  ;;  %p258_p1 = scmp.lt.s32.totalorder %s16_s10, %s16_s10 }
   0x5   :  { %p254_p0 = scmp.ne.s32.totalorder %s16_s10, %s253_s11  ;;  %p259_p2 = scmp.lt.s32.totalorder %s253_s11, %s253_s11 }
   0x7   :  { %p260_p3 = por %p259_p2, %p258_p1 }
   0x9   :  { %p261_p4 = pnand %p260_p3, %p254_p0 }
   0xb   :  { %264 = shalt.err (!%p261_p4)
}
   0xc   :  { %s312_s12 = smov 128   ;;  %s313_s13 = smov 8  }
   0xd   :  { %21 = dma.hbm_to_vmem [thread:$0]  %s346_s0, 256, %s16_s10, [#allocation3], %s312_s12, %s312_s12, %s313_s13  }
   0xe   :  { %s314_s16 = smov [#allocation5]  }
   0xf   :  { %s28_s17 = sshll.u32 %s314_s16, 4  ;;  %s29_s17 = int_to_ptr.vmem [resolvable:$true] %s28_s17 }
  0x10   :  { %s273_s18 = scalar_lea.vmem %s29_s17, 128  ;;  %p278_p6 = scmp.lt.s32.totalorder %s29_s17, %s29_s17 }
  0x11   :  { %p274_p5 = scmp.ne.s32.totalorder %s29_s17, %s273_s18  ;;  %p279_p7 = scmp.lt.s32.totalorder %s273_s18, %s273_s18 }
  0x13   :  { %p280_p8 = por %p279_p7, %p278_p6 }
  0x15   :  { %p281_p9 = pnand %p280_p8, %p274_p5 }
  0x17   :  { %284 = shalt.err (!%p281_p9)
}
  0x18   :  { %31 = dma.hbm_to_vmem [thread:$0]  %s347_s1, 128, %s29_s17, [#allocation6]  }
  0x19   :  { %305 = dma.done.wait [#allocation3], 256  }
  0x1a   :  { %306 = vsyncadd [#allocation3], 4294967040 }
  0x1b   :  { %307 = dma.done.wait [#allocation6], 128  }
  0x1c   :  { %308 = vsyncadd [#allocation6], 4294967168  ;;  %v38_v0 = vld [vmem:[#allocation2] sm:$0xff]  ;;  %v221_v1 = vld [vmem:[#allocation5 + $0x1] ss:$0 sm:$0xff]  ;;  %v66_v9 = vlaneseq  ;;  %vm76_vm0 = vcmask 1041409  }
  0x1d   :  { %v39_v2 = vld [vmem:[#allocation2 + $0x8] sm:$0xff]  ;;  %v58_v3 = vmul.f32 %v221_v1, %v38_v0  ;;  %v220_v5 = vld [vmem:[#allocation5] ss:$0 sm:$0xff]  ;;  %v43_v8 = vld [vmem:[#allocation5 + $0x3] sm:$0x1]  ;;  %vm79_vm1 = vcmask 58368  }
  0x1e   :  { %v59_v4 = vmul.f32 %v221_v1, %v39_v2  ;;  %v49_v6 = vmul.f32 %v220_v5, %v39_v2  ;;  %v48_v7 = vmul.f32 %v220_v5, %v38_v0  ;;  %231 = vpush %v43_v8  ;;  %v67_v10 = vand.u32 127, %v66_v9  ;;  %v42_v42 = vld [vmem:[#allocation5 + $0x2] sm:$0x1]  ;;  %s319_s1 = smov [#allocation7]  }
  0x1f   :  { %60 = vadd.xlane.f32.xlu0 %v58_v3  ;;  %v69_v11 = vshrl.u32 %v66_v9, 7  ;;  %v315_v19 = vmov 0   ;;  %v316_v33 = vmov 0.0   ;;  %vm317_vm2 = vmmov 0   ;;  %s210_s21 = sshll.u32 %s319_s1, 4  ;;  %s211_s21 = int_to_ptr.vmem [resolvable:$true] %s210_s21 }
  0x20   :  { %243 = vset.pattern.permute.xlu0 %v315_v19  ;;  %242 = vset.pattern.permute.xlu1 %v315_v19  ;;  %v318_v36 = vmov 1   ;;  %vm126_vm3 = vcmask 64512   ;;  %vm202_vm4 = vcmask 8192   ;;  %s285_s22 = scalar_lea.vmem %s211_s21, 16  ;;  %s289_s23 = scalar_lea.vmem %s211_s21, 32 }
  0x21   :  { %v70_v13 = vsub.s32 %v67_v10, %v69_v11  ;;  %v91_v20 = vsub.s32 1, %v69_v11  ;;  %v87_v21 = vsub.s32 0, %v69_v11  ;;  %226 = vmatprep.subr.mxu0 %v316_v33  ;;  %228 = vmatprep.mubr.msk.f32.mxu0 %vm317_vm2, %v316_v33  ;;  %p286_p10 = scmp.ne.s32.totalorder %s211_s21, %s285_s22  ;;  %p290_p11 = scmp.lt.s32.totalorder %s211_s21, %s211_s21 }
  0x22   :  { %p291_p12 = scmp.lt.s32.totalorder %s289_s23, %s285_s22 }
  0x23   :  { %62 = vadd.xlane.f32.xlu0 %v59_v4 }
  0x24   :  { %p292_p13 = por %p291_p12, %p290_p11 }
  0x26   :  { %p293_p0 = pnand %p292_p13, %p286_p10 }
  0x27   :  { %52 = vadd.xlane.f32.xlu0 %v49_v6 }
  0x4f   :  { %s232_s0 = spop %231 }
  0x50   :  { %v99_v28 = vstv %s232_s0 }
  0xa8   :  { %v61_v12 = vpop.xlane.xlu0 %60 }
  0xa9   :  { %v71_v15 = vrot.slane %v61_v12, %v70_v13 }
  0xac   :  { %v63_v14 = vpop.xlane.xlu0 %62 }
  0xad   :  { %v75_v16 = vrot.slane %v63_v14, %v70_v13 }
  0xaf   :  { %v77_v17 = vsel %vm76_vm0, %v75_v16, %v71_v15 }
  0xb0   :  { %v80_v18 = vsel %vm79_vm1, %v77_v17, 0.0  ;;  %v53_v24 = vpop.xlane.xlu0 %52 }
  0xb1   :  { %81 = vadd.xlane.f32.xlu1 %v80_v18 }
  0xb5   :  { %50 = vadd.xlane.f32.xlu1 %v48_v7 }
 0x13a   :  { %v82_v22 = vpop.xlane.xlu1 %81 }
 0x13b   :  { %v83_v23 = vmul.f32 0.125, %v82_v22 }
 0x13d   :  { %v92_v25 = vrot.slane %v83_v23, %v91_v20  ;;  %v88_v26 = vrot.slane %v83_v23, %v87_v21 }
 0x13e   :  { %v51_v27 = vpop.xlane.xlu1 %50 }
 0x13f   :  { %v96_v29 = vadd.f32 %v92_v25, %v53_v24  ;;  %v95_v30 = vadd.f32 %v88_v26, %v51_v27 }
 0x141   :  { %v101_v31 = vadd.f32 %v99_v28, %v95_v30  ;;  %v102_v32 = vadd.f32 %v99_v28, %v96_v29 }
 0x143   :  { %v103_v34 = vmax.f32 %v101_v31, 0.0  ;;  %v104_v35 = vmax.f32 %v102_v32, 0.0 }
 0x145   :  { %115 = vperm.xlu0 %243, %v104_v35   ;;  %112 = vperm.xlu1 %242, %v103_v34  }
 0x149   :  { %244 = vset.pattern.permute.xlu1 %v318_v36 }
 0x14a   :  { %106 = vperm.xlu1 %244, %v43_v8  }
 0x1c0   :  { %v116_v37 = vpop.permute.xlu0 %115  ;;  %v113_v38 = vpop.permute.xlu1 %112 }
 0x1c1   :  { %v124_v39 = vrot.slane %v116_v37, %v70_v13  ;;  %v120_v40 = vrot.slane %v113_v38, %v70_v13 }
 0x1c3   :  { %v125_v41 = vsel %vm76_vm0, %v124_v39, %v120_v40 }
 0x1c4   :  { %227 = vmatpush3.xpose.msk.msra.mxu0 %vm126_vm3, %v125_v41 }
 0x1c5   :  { %v107_v43 = vpop.permute.xlu1 %106 }
 0x1c7   :  { %229 = vmatmul.mubr.msk.f32.vlgmr.msra.gmra.mxu0 %vm126_vm3, %v42_v42 }
 0x287   :  { %v198_v44 = vpop.f32.mrf.mxu0 }
 0x288   :  { %v199_v45 = vadd.f32 %v198_v44, %v107_v43 }
 0x289   :  { %v230_v46 = vpop.f32.mrf.mxu0 }
 0x28a   :  { %203 = vst.msk [vmem:[#allocation7] sm:$0x1] %vm202_vm4, %v199_v45 }
 0x28b   :  { %296 = shalt.err (!%p293_p0)
}
 0x28c   :  { %213 = dma.vmem_to_hbm [thread:$0]  %s211_s21, 16, %s348_s2, [#allocation4]  }
 0x28d   :  { %309 = dma.done.wait [#allocation4], 16  }
 0x28e   :  { %310 = vsyncadd [#allocation4], 4294967280 }
 0x28f   :  { %217 = vsyncpa [#allocation3], 1 }
 0x290   :  { %218 = vsyncpa [#allocation6], 1 }
 0x291   :  { %219 = vsyncpa [#allocation4], 1 }

</bundles_post_ra>
